<compile_context>
chip_gen: v6e
topology: v6e:2x2x1
jax: 0.10.0
libtpu: 0.0.40
codegen_flags: <defaults>
</compile_context>

<pallas_src>
import functools

import jax
import jax.numpy as jnp
import numpy as np
from jax import lax
from jax.experimental import pallas as pl
from jax.experimental.pallas import tpu as pltpu


def create_position_encoding(width: int, height: int, normalized: bool = True):
    """Numpy replica of the PyTorch helper (returns flattened pos_x, pos_y)."""
    if normalized:
        pos_x, pos_y = np.meshgrid(
            np.linspace(0.0, 1.0, height), np.linspace(0.0, 1.0, width), indexing="xy"
        )
    else:
        pos_x, pos_y = np.meshgrid(
            np.linspace(0, height - 1, height), np.linspace(0, width - 1, width), indexing="xy"
        )
    pos_x = pos_x.reshape(height * width).astype(np.float32)
    pos_y = pos_y.reshape(height * width).astype(np.float32)
    return pos_x, pos_y


def _round_up(x: int, m: int) -> int:
    return ((x + m - 1) // m) * m


def _choose_row_tile(bc_rows: int, hw: int, vmem_capacity: int) -> int:
    """Pick the row tile TM from a generation-aware per-step VMEM budget."""
    small_vmem = vmem_capacity <= 64 * 1024 * 1024          # v7x-class (64 MiB / TC)
    budget = (24 if small_vmem else 56) * 1024 * 1024       # v5e/v6e have 128 MiB
    # Resident (HW, 128) f32 MXU operand (count x2 for buffering headroom).
    pos_bytes = 2 * hw * 128 * 4
    avail = max(budget - pos_bytes, 2 * 1024 * 1024)
    # Double-buffered per-step footprint: x in + att out (each 2 * TM*HW*4)
    # plus the tiny keys out block (2 * TM*8*4).
    bytes_per_row = 4 * hw * 4 + 2 * 8 * 4
    tm = avail // max(bytes_per_row, 1)
    tm = max(8, min(1024, (tm // 8) * 8))
    # Keep >= ~8 grid steps when the row count allows it (pipelining overlap,
    # megacore sharding of the "parallel" axis on v7x).
    tm = min(tm, max(8, _round_up(pl.cdiv(bc_rows, 8), 8)))
    # Never exceed the (8-rounded) total row count.
    tm = min(tm, _round_up(bc_rows, 8))
    return int(tm)


def _spatial_softmax_kernel(x_ref, pos_ref, att_ref, keys_ref, *, temperature):
    # x_ref:    (TM, HW)   logits tile
    # pos_ref:  (HW, 128)  resident MXU operand; col 0 = pos_x, col 1 = pos_y, rest 0
    # att_ref:  (TM, HW)   softmax attention map tile (output)
    # keys_ref: (TM, 8)    keys (lane 0 = expected_x, lane 1 = expected_y) (output)
    inv_temp = jnp.float32(1.0 / temperature)
    logit = x_ref[...] * inv_temp
    m = jnp.max(logit, axis=-1, keepdims=True)
    e = jnp.exp(logit - m)
    denom = jnp.sum(e, axis=-1, keepdims=True)
    # Exact reciprocal: approx=True (~2^-12 rel err) would not meet the 1e-5 check.
    inv = pl.reciprocal(denom, approx=False)

    att_ref[...] = e * inv

    # Position-weighted reductions on the idle MXU: one (TM,HW)x(HW,128) matmul
    # replaces the VPU multiplies + XLU reductions + keys-slab construction.
    # HIGHEST precision -> multi-pass f32 matmul; error well under 1e-5.
    k = jnp.dot(
        e, pos_ref[...],
        preferred_element_type=jnp.float32,
        precision=lax.Precision.HIGHEST,
    )
    keys_ref[...] = k[:, :8] * inv


def spatial_softmax(x, pos_x, pos_y, temperature=0.0001):
    """x: (B, C, W, H) float32  ->  (keys (B, C, 2), att_map (B, C, W, H))."""
    # TODO(synk): temperature is baked in as a static compile-time constant; pass
    # it as an SMEM scalar instead if it must be a runtime/learnable parameter.
    B, C, W, H = x.shape
    BC, HW = B * C, W * H

    try:
        vmem_cap = int(pltpu.get_tpu_info().vmem_capacity_bytes)
    except Exception:
        vmem_cap = 64 * 1024 * 1024  # conservative (v7x-sized) fallback
    TM = _choose_row_tile(BC, HW, vmem_cap)
    vmem_limit = (48 if vmem_cap <= 64 * 1024 * 1024 else 80) * 1024 * 1024

    x_flat = x.reshape(BC, HW).astype(jnp.float32)

    # Resident MXU operand: column 0 = pos_x, column 1 = pos_y, rest zero.
    pos = jnp.zeros((HW, 128), jnp.float32)
    pos = pos.at[:, 0].set(pos_x.reshape(HW).astype(jnp.float32))
    pos = pos.at[:, 1].set(pos_y.reshape(HW).astype(jnp.float32))

    kernel = functools.partial(_spatial_softmax_kernel, temperature=float(temperature))
    grid = (pl.cdiv(BC, TM),)

    att, keys8 = pl.pallas_call(
        kernel,
        out_shape=(
            jax.ShapeDtypeStruct((BC, HW), jnp.float32),
            jax.ShapeDtypeStruct((BC, 8), jnp.float32),
        ),
        grid=grid,
        in_specs=[
            pl.BlockSpec((TM, HW), lambda i: (i, 0)),
            pl.BlockSpec((HW, 128), lambda i: (0, 0)),   # resident across the grid
        ],
        out_specs=(
            pl.BlockSpec((TM, HW), lambda i: (i, 0)),
            pl.BlockSpec((TM, 8), lambda i: (i, 0)),
        ),
        compiler_params=pltpu.CompilerParams(
            dimension_semantics=("parallel",),
            vmem_limit_bytes=vmem_limit,
        ),
    )(x_flat, pos)

    keys = keys8[:, :2].reshape(B, C, 2)
    att_map = att.reshape(-1, C, W, H)
    return keys, att_map


def _reference(x, pos_x, pos_y, temperature=0.0001):
    B, C, W, H = x.shape
    logit = x.reshape(B, C, -1) / temperature
    att = jax.nn.softmax(logit, axis=-1)
    ex = jnp.sum(pos_x * att, axis=-1, keepdims=True)
    ey = jnp.sum(pos_y * att, axis=-1, keepdims=True)
    keys = jnp.concatenate([ex, ey], axis=-1).reshape(B, C, 2)
    return keys, att.reshape(-1, C, W, H)


if __name__ == "__main__":
    B, C, W, H = 2, 4, 16, 16
    temperature = 0.0001

    key = jax.random.PRNGKey(0)
    x = jax.random.normal(key, (B, C, W, H), dtype=jnp.float32)

    pos_x_np, pos_y_np = create_position_encoding(W, H, normalized=True)
    pos_x = jnp.asarray(pos_x_np)
    pos_y = jnp.asarray(pos_y_np)

    keys_out, att_map = spatial_softmax(x, pos_x, pos_y, temperature)
    jax.block_until_ready((keys_out, att_map))

    keys_ref, att_ref = _reference(x, pos_x, pos_y, temperature)
    assert keys_out.shape == (B, C, 2)
    assert att_map.shape == (B, C, W, H)
    np.testing.assert_allclose(np.asarray(keys_out), np.asarray(keys_ref), atol=1e-5, rtol=1e-5)
    np.testing.assert_allclose(np.asarray(att_map), np.asarray(att_ref), atol=1e-5, rtol=1e-5)

    print("KERNEL_OK")
</pallas_src>

<mosaic_0001>
module attributes {stable_mosaic.version = 11 : i64} {
  func.func @_spatial_softmax_kernel(%arg0: i32, %arg1: memref<8x256xf32, #tpu.memory_space<vmem>>, %arg2: memref<256x128xf32, #tpu.memory_space<vmem>>, %arg3: memref<8x256xf32, #tpu.memory_space<vmem>>, %arg4: memref<8x8xf32, #tpu.memory_space<vmem>>) attributes {dimension_semantics = [#tpu.dimension_semantics<parallel>], iteration_bounds = array<i64: 1>, scalar_prefetch = 0 : i64, scratch_operands = 0 : i64, tpu.core_type = #tpu.core_type<tc>, window_params = [{transform_indices = @transform_0, window_bounds = array<i64: 8, 256>}, {pipeline_mode = #tpu.pipeline_mode<synchronous>, transform_indices = @transform_1, window_bounds = array<i64: 256, 128>}, {transform_indices = @transform_2, window_bounds = array<i64: 8, 256>}, {transform_indices = @transform_3, window_bounds = array<i64: 8, 8>}]} {
    %c0 = arith.constant 0 : index
    %c0_0 = arith.constant 0 : index
    %0 = vector.load %arg1[%c0, %c0_0] : memref<8x256xf32, #tpu.memory_space<vmem>>, vector<8x256xf32>
    %cst = arith.constant 1.000000e+04 : f32
    %1 = vector.broadcast %cst : f32 to vector<8x256xf32>
    %2 = arith.mulf %0, %1 : vector<8x256xf32>
    %cst_1 = arith.constant dense<0xFF800000> : vector<8xf32>
    %3 = vector.multi_reduction <maximumf>, %2, %cst_1 [1] : vector<8x256xf32> to vector<8xf32>
    %4 = vector.shape_cast %3 : vector<8xf32> to vector<8x1xf32>
    %5 = vector.broadcast %4 : vector<8x1xf32> to vector<8x256xf32>
    %6 = arith.subf %2, %5 : vector<8x256xf32>
    %7 = math.exp %6 : vector<8x256xf32>
    %cst_2 = arith.constant dense<0.000000e+00> : vector<8xf32>
    %8 = vector.multi_reduction <add>, %7, %cst_2 [1] : vector<8x256xf32> to vector<8xf32>
    %9 = vector.shape_cast %8 : vector<8xf32> to vector<8x1xf32>
    %10 = tpu.reciprocal %9 : vector<8x1xf32> -> vector<8x1xf32>
    %11 = vector.broadcast %10 : vector<8x1xf32> to vector<8x256xf32>
    %12 = arith.mulf %7, %11 : vector<8x256xf32>
    %c0_3 = arith.constant 0 : index
    %c0_4 = arith.constant 0 : index
    %13 = vector.load %arg3[%c0_3, %c0_4] : memref<8x256xf32, #tpu.memory_space<vmem>>, vector<8x256xf32>
    tpu.vector_store %arg3[%c0_3, %c0_4], %12 {strides = array<i32>} : memref<8x256xf32, #tpu.memory_space<vmem>>, vector<8x256xf32>,
    %c0_5 = arith.constant 0 : index
    %c0_6 = arith.constant 0 : index
    %14 = vector.load %arg2[%c0_5, %c0_6] : memref<256x128xf32, #tpu.memory_space<vmem>>, vector<256x128xf32>
    %cst_7 = arith.constant dense<0.000000e+00> : vector<8x128xf32>
    %15 = tpu.matmul %7, %14, %cst_7 {dimension_numbers = #tpu.dot_dimension_numbers<[1], [0], [0], [1], [0, 0, 1, 1], [], []>, precision = #tpu.contract_precision<fp32>} : vector<8x256xf32>, vector<256x128xf32>, vector<8x128xf32> -> vector<8x128xf32>
    %16 = vector.extract_strided_slice %15 {offsets = [0, 0], sizes = [8, 8], strides = [1, 1]} : vector<8x128xf32> to vector<8x8xf32>
    %17 = vector.broadcast %10 : vector<8x1xf32> to vector<8x8xf32>
    %18 = arith.mulf %16, %17 : vector<8x8xf32>
    %c0_8 = arith.constant 0 : index
    %c0_9 = arith.constant 0 : index
    %19 = vector.load %arg4[%c0_8, %c0_9] : memref<8x8xf32, #tpu.memory_space<vmem>>, vector<8x8xf32>
    tpu.vector_store %arg4[%c0_8, %c0_9], %18 {strides = array<i32>} : memref<8x8xf32, #tpu.memory_space<vmem>>, vector<8x8xf32>,
    return
  }
  func.func @transform_0(%arg0: i32) -> (i32, i32) {
    %c0_i32 = arith.constant 0 : i32
    %c0_i32_0 = arith.constant 0 : i32
    return %arg0, %c0_i32 : i32, i32
  }
  func.func @transform_1(%arg0: i32) -> (i32, i32) {
    %c0_i32 = arith.constant 0 : i32
    %c0_i32_0 = arith.constant 0 : i32
    %c0_i32_1 = arith.constant 0 : i32
    return %c0_i32, %c0_i32_0 : i32, i32
  }
  func.func @transform_2(%arg0: i32) -> (i32, i32) {
    %c0_i32 = arith.constant 0 : i32
    %c0_i32_0 = arith.constant 0 : i32
    return %arg0, %c0_i32 : i32, i32
  }
  func.func @transform_3(%arg0: i32) -> (i32, i32) {
    %c0_i32 = arith.constant 0 : i32
    %c0_i32_0 = arith.constant 0 : i32
    return %arg0, %c0_i32 : i32, i32
  }
}

</mosaic_0001>

<bundles_post_ra>
// kernel: tpu_custom_call.1
= control target key start
LH: loop header
LB: loop body
LE: loop exit
PB: predicated region body
PF: predicated region fallthrough
CT: control target
= control target key end

     0   :  { %9 = vsyncpa [#allocation3], 0  ;;  %s1858_s0 = inlined_call_operand.hbm [shape: f32[8,256], index: 0, kind: input, shape index: {}]   ;;  %s1859_s1 = inlined_call_operand.hbm [shape: f32[256,128], index: 1, kind: input, shape index: {}]   ;;  %s1860_s2 = inlined_call_operand.hbm [shape: f32[8,256], index: 2, kind: output, shape index: {0}]   ;;  %s1861_s3 = inlined_call_operand.hbm [shape: f32[8,8], index: 3, kind: output, shape index: {1}]  }
   0x1   :  { %10 = vsyncpa [#allocation6], 0 }
   0x2   :  { %11 = vsyncpa [#allocation4], 0 }
   0x3   :  { %12 = vsyncpa [#allocation9], 0  ;;  %s1299_s12 = smov [#allocation2]   ;;  %s1300_s14 = smov [#allocation5]  }
   0x4   :  { %s19_s13 = sshll.u32 %s1299_s12, 4  ;;  %s28_s15 = sshll.u32 %s1300_s14, 4  ;;  %s20_s13 = int_to_ptr.vmem [resolvable:$true] %s19_s13  ;;  %s29_s15 = int_to_ptr.vmem [resolvable:$true] %s28_s15 }
   0x5   :  { %s1219_s16 = scalar_lea.vmem %s20_s13, 256  ;;  %p1224_p1 = scmp.lt.s32.totalorder %s20_s13, %s20_s13 }
   0x6   :  { %p1220_p0 = scmp.ne.s32.totalorder %s20_s13, %s1219_s16  ;;  %p1225_p2 = scmp.lt.s32.totalorder %s1219_s16, %s1219_s16 }
   0x8   :  { %p1226_p3 = por %p1225_p2, %p1224_p1 }
   0xa   :  { %p1227_p4 = pnand %p1226_p3, %p1220_p0 }
   0xc   :  { %1230 = shalt.err (!%p1227_p4)
}
   0xd   :  { %22 = dma.hbm_to_vmem [thread:$0]  %s1858_s0, 256, %s20_s13, [#allocation3]  }
   0xe   :  { %s1239_s19 = scalar_lea.vmem %s29_s15, 4096  ;;  %p1244_p6 = scmp.lt.s32.totalorder %s29_s15, %s29_s15 }
   0xf   :  { %p1240_p5 = scmp.ne.s32.totalorder %s29_s15, %s1239_s19  ;;  %p1245_p7 = scmp.lt.s32.totalorder %s1239_s19, %s1239_s19 }
  0x11   :  { %p1246_p8 = por %p1245_p7, %p1244_p6 }
  0x13   :  { %p1247_p9 = pnand %p1246_p8, %p1240_p5 }
  0x15   :  { %1250 = shalt.err (!%p1247_p9)
}
  0x16   :  { %s1301_s20 = smov 128   ;;  %s1302_s21 = smov 8  }
  0x17   :  { %34 = dma.hbm_to_vmem [thread:$0]  %s1859_s1, 4096, %s29_s15, [#allocation6], %s1301_s20, %s1301_s20, %s1302_s21  }
  0x18   :  { %1291 = dma.done.wait [#allocation3], 256  }
  0x19   :  { %1292 = vsyncadd [#allocation3], 4294967040 }
  0x1a   :  { %1293 = dma.done.wait [#allocation6], 4096  }
  0x1b   :  { %1294 = vsyncadd [#allocation6], 4294963200  ;;  %v41_v0 = vld [vmem:[#allocation2] sm:$0xff]  ;;  %v42_v1 = vld [vmem:[#allocation2 + $0x8] sm:$0xff]  ;;  %s1303_s0 = smov [#allocation7]  }
  0x1c   :  { %v93_v2 = vld [vmem:[#allocation5 + $0xf8] sm:$0xff]  ;;  %v1331_v3 = vmul.f32 10000.0, %v41_v0  ;;  %v1333_v4 = vmul.f32 10000.0, %v42_v1  ;;  %v92_v7 = vld [vmem:[#allocation5 + $0xf0] sm:$0xff]  ;;  %v91_v12 = vld [vmem:[#allocation5 + $0xe8] sm:$0xff]  ;;  %s965_s1 = sshll.u32 %s1303_s0, 4  ;;  %s966_s1 = int_to_ptr.vmem [resolvable:$true] %s965_s1 }
  0x1d   :  { %v1335_v5 = vand.u32 4294901760, %v93_v2  ;;  %v77_v6 = vld [vmem:[#allocation5 + $0x78] sm:$0xff]  ;;  %v76_v8 = vld [vmem:[#allocation5 + $0x70] sm:$0xff]  ;;  %v1339_v10 = vand.u32 4294901760, %v92_v7  ;;  %v75_v13 = vld [vmem:[#allocation5 + $0x68] sm:$0xff]  ;;  %v1348_v17 = vand.u32 4294901760, %v91_v12  ;;  %p1256_p11 = scmp.lt.s32.totalorder %s966_s1, %s966_s1 }
  0x1e   :  { %v1337_v9 = vand.u32 4294901760, %v77_v6  ;;  %v1341_v11 = vand.u32 4294901760, %v76_v8  ;;  %v90_v14 = vld [vmem:[#allocation5 + $0xe0] sm:$0xff]  ;;  %v45_v15 = vmax.f32 %v1331_v3, %v1333_v4  ;;  %v1350_v18 = vand.u32 4294901760, %v75_v13  ;;  %v89_v40 = vld [vmem:[#allocation5 + $0xd8] sm:$0xff]  ;;  %v88_v46 = vld [vmem:[#allocation5 + $0xd0] sm:$0xff] }
  0x1f   :  { %v1346_v16 = vsub.f32 %v93_v2, %v1335_v5  ;;  %v74_v19 = vld [vmem:[#allocation5 + $0x60] sm:$0xff]  ;;  %989 = vmatprep.subr.mxu0 %v1335_v5  ;;  %v1357_v21 = vsub.f32 %v92_v7, %v1339_v10  ;;  %v1362_v23 = vand.u32 4294901760, %v90_v14  ;;  %v1367_v25 = vsub.f32 %v91_v12, %v1348_v17  ;;  %v73_v45 = vld [vmem:[#allocation5 + $0x58] sm:$0xff]  ;;  %v72_v47 = vld [vmem:[#allocation5 + $0x50] sm:$0xff]  ;;  %s1251_s24 = scalar_lea.vmem %s966_s1, 256 }
  0x20   :  { %v1354_v20 = vsub.f32 %v77_v6, %v1337_v9  ;;  %v1360_v22 = vsub.f32 %v76_v8, %v1341_v11  ;;  %990 = vmatpush3.msra.mxu0 %v1337_v9  ;;  %46 = vmax.xlane.f32.xlu0 %v45_v15  ;;  %v1370_v26 = vsub.f32 %v75_v13, %v1350_v18  ;;  %v1372_v27 = vand.u32 4294901760, %v74_v19  ;;  %v87_v52 = vld [vmem:[#allocation5 + $0xc8] sm:$0xff]  ;;  %v86_v58 = vld [vmem:[#allocation5 + $0xc0] sm:$0xff]  ;;  %p1252_p10 = scmp.ne.s32.totalorder %s966_s1, %s1251_s24  ;;  %p1257_p12 = scmp.lt.s32.totalorder %s1251_s24, %s1251_s24 }
  0x21   :  { %v1880_v24 = vand.u32 4294901760, %v1346_v16  ;;  %991 = vmatprep.subr.mxu0 %v1339_v10  ;;  %v1876_v29 = vand.u32 4294901760, %v1357_v21  ;;  %v1379_v31 = vsub.f32 %v90_v14, %v1362_v23  ;;  %v1873_v33 = vand.u32 4294901760, %v1367_v25  ;;  %v71_v53 = vld [vmem:[#allocation5 + $0x48] sm:$0xff]  ;;  %v70_v63 = vld [vmem:[#allocation5 + $0x40] sm:$0xff] }
  0x22   :  { %v1877_v28 = vand.u32 4294901760, %v1354_v20  ;;  %v1874_v30 = vand.u32 4294901760, %v1360_v22  ;;  %992 = vmatpush3.msra.mxu0 %v1341_v11  ;;  %v1872_v34 = vand.u32 4294901760, %v1370_v26  ;;  %v1388_v35 = vsub.f32 %v74_v19, %v1372_v27  ;;  %p1258_p13 = por %p1257_p12, %p1256_p11 }
  0x23   :  { %v322_v32 = vsub.f32 %v1346_v16, %v1880_v24  ;;  %993 = vmatprep.subr.mxu0 %v1348_v17  ;;  %v329_v37 = vsub.f32 %v1357_v21, %v1876_v29  ;;  %v1870_v39 = vand.u32 4294901760, %v1379_v31  ;;  %v336_v42 = vsub.f32 %v1367_v25, %v1873_v33  ;;  %v65_v24 = vld [vmem:[#allocation5 + $0x18] sm:$0xff] }
  0x24   :  { %v210_v36 = vsub.f32 %v1354_v20, %v1877_v28  ;;  %v217_v38 = vsub.f32 %v1360_v22, %v1874_v30  ;;  %994 = vmatpush3.msra.mxu0 %v1350_v18  ;;  %v224_v43 = vsub.f32 %v1370_v26, %v1872_v34  ;;  %v1868_v44 = vand.u32 4294901760, %v1388_v35  ;;  %v81_v28 = vld [vmem:[#allocation5 + $0x98] sm:$0xff]  ;;  %p1259_p0 = pnand %p1258_p13, %p1252_p10 }
  0x25   :  { %v323_v41 = vand.u32 4294901760, %v322_v32  ;;  %995 = vmatprep.subr.mxu0 %v1362_v23  ;;  %v330_v49 = vand.u32 4294901760, %v329_v37  ;;  %v343_v51 = vsub.f32 %v1379_v31, %v1870_v39  ;;  %v337_v54 = vand.u32 4294901760, %v336_v42  ;;  %v66_v39 = vld [vmem:[#allocation5 + $0x20] sm:$0xff] }
  0x26   :  { %v211_v48 = vand.u32 4294901760, %v210_v36  ;;  %v218_v50 = vand.u32 4294901760, %v217_v38  ;;  %996 = vmatpush3.msra.mxu0 %v1372_v27  ;;  %v225_v55 = vand.u32 4294901760, %v224_v43  ;;  %v231_v56 = vsub.f32 %v1388_v35, %v1868_v44 }
  0x27   :  { %1024 = vmatprep.subr.mxu1 %v323_v41  ;;  %v1417_v57 = vand.u32 4294901760, %v89_v40  ;;  %v344_v59 = vand.u32 4294901760, %v343_v51  ;;  %v1419_v60 = vand.u32 4294901760, %v73_v45  ;;  %v1421_v61 = vand.u32 4294901760, %v88_v46 }
  0x28   :  { %1025 = vmatpush3.msra.mxu1 %v211_v48  ;;  %v1423_v62 = vand.u32 4294901760, %v72_v47  ;;  %v232_v0 = vand.u32 4294901760, %v231_v56  ;;  %v1428_v2 = vand.u32 4294901760, %v87_v52  ;;  %v1430_v6 = vand.u32 4294901760, %v71_v53  ;;  %v84_v56 = vld [vmem:[#allocation5 + $0xb0] sm:$0xff] }
  0x29   :  { %1026 = vmatprep.subr.mxu1 %v330_v49  ;;  %v1426_v1 = vsub.f32 %v89_v40, %v1417_v57  ;;  %997 = vmatprep.subr.mxu0 %v1417_v57  ;;  %v1434_v7 = vsub.f32 %v73_v45, %v1419_v60  ;;  %v1437_v8 = vsub.f32 %v88_v46, %v1421_v61  ;;  %v1442_v13 = vand.u32 4294901760, %v86_v58 }
  0x2a   :  { %1027 = vmatpush3.msra.mxu1 %v218_v50  ;;  %v1440_v12 = vsub.f32 %v72_v47, %v1423_v62  ;;  %998 = vmatpush3.msra.mxu0 %v1419_v60  ;;  %v1447_v15 = vsub.f32 %v87_v52, %v1428_v2  ;;  %v1450_v19 = vsub.f32 %v71_v53, %v1430_v6  ;;  %v1452_v32 = vand.u32 4294901760, %v70_v63  ;;  %v85_v50 = vld [vmem:[#allocation5 + $0xb8] sm:$0xff] }
  0x2b   :  { %1028 = vmatprep.subr.mxu1 %v337_v54  ;;  %v1867_v14 = vand.u32 4294901760, %v1426_v1  ;;  %999 = vmatprep.subr.mxu0 %v1421_v61  ;;  %v1866_v36 = vand.u32 4294901760, %v1434_v7  ;;  %v1865_v37 = vand.u32 4294901760, %v1437_v8  ;;  %v1459_v40 = vsub.f32 %v86_v58, %v1442_v13  ;;  %v68_v58 = vld [vmem:[#allocation5 + $0x30] sm:$0xff] }
  0x2c   :  { %1029 = vmatpush3.msra.mxu1 %v225_v55  ;;  %v1862_v38 = vand.u32 4294901760, %v1440_v12  ;;  %1000 = vmatpush3.msra.mxu0 %v1423_v62  ;;  %v1863_v42 = vand.u32 4294901760, %v1447_v15  ;;  %v1864_v43 = vand.u32 4294901760, %v1450_v19  ;;  %v1468_v45 = vsub.f32 %v70_v63, %v1452_v32  ;;  %v69_v55 = vld [vmem:[#allocation5 + $0x38] sm:$0xff] }
  0x2d   :  { %1928 = vst [vmem:[#allocation14_spill] sm:$0xff] %v1459_v40  ;;  %1030 = vmatprep.subr.mxu1 %v344_v59  ;;  %v350_v41 = vsub.f32 %v1426_v1, %v1867_v14  ;;  %1001 = vmatprep.subr.mxu0 %v1428_v2  ;;  %v238_v46 = vsub.f32 %v1434_v7, %v1866_v36  ;;  %v1869_v49 = vand.u32 4294901760, %v1459_v40  ;;  %v1497_v14 = vand.u32 4294901760, %v85_v50 }
  0x2e   :  { %1929 = vst [vmem:[#allocation15_spill] sm:$0xff] %v1468_v45  ;;  %1031 = vmatpush3.msra.mxu1 %v232_v0  ;;  %v357_v47 = vsub.f32 %v1437_v8, %v1865_v37  ;;  %v245_v48 = vsub.f32 %v1440_v12, %v1862_v38  ;;  %1002 = vmatpush3.msra.mxu0 %v1430_v6  ;;  %v1871_v54 = vand.u32 4294901760, %v1468_v45  ;;  %v83_v38 = vld [vmem:[#allocation5 + $0xa8] sm:$0xff]  ;;  %v1501_v44 = vand.u32 4294901760, %v84_v56 }
  0x2f   :  { %v351_v51 = vand.u32 4294901760, %v350_v41  ;;  %v364_v52 = vsub.f32 %v1447_v15, %v1863_v42  ;;  %v252_v53 = vsub.f32 %v1450_v19, %v1864_v43  ;;  %1003 = vmatprep.subr.mxu0 %v1442_v13  ;;  %v239_v59 = vand.u32 4294901760, %v238_v46  ;;  %v67_v42 = vld [vmem:[#allocation5 + $0x28] sm:$0xff]  ;;  %v82_v46 = vld [vmem:[#allocation5 + $0xa0] sm:$0xff] }
  0x30   :  { %v358_v63 = vand.u32 4294901760, %v357_v47  ;;  %v246_v0 = vand.u32 4294901760, %v245_v48  ;;  %v371_v41 = vsub.f32 %v1459_v40, %v1869_v49  ;;  %1004 = vmatpush3.msra.mxu0 %v1452_v32  ;;  %v259_v36 = vsub.f32 %v1468_v45, %v1871_v54  ;;  %v79_v45 = vld [vmem:[#allocation5 + $0x88] sm:$0xff] }
  0x31   :  { %1032 = vmatprep.subr.mxu1 %v351_v51  ;;  %v365_v43 = vand.u32 4294901760, %v364_v52  ;;  %v253_v37 = vand.u32 4294901760, %v252_v53  ;;  %v1499_v48 = vand.u32 4294901760, %v69_v55  ;;  %v1503_v49 = vand.u32 4294901760, %v68_v58  ;;  %1005 = vmatprep.subr.mxu0 %v1497_v14 }
  0x32   :  { %1033 = vmatpush3.msra.mxu1 %v239_v59  ;;  %v372_v47 = vand.u32 4294901760, %v371_v41  ;;  %v260_v51 = vand.u32 4294901760, %v259_v36  ;;  %v1506_v52 = vsub.f32 %v85_v50, %v1497_v14  ;;  %v1508_v53 = vand.u32 4294901760, %v83_v38 }
  0x33   :  { %1034 = vmatprep.subr.mxu1 %v358_v63  ;;  %v1510_v54 = vand.u32 4294901760, %v67_v42  ;;  %v1514_v59 = vsub.f32 %v69_v55, %v1499_v48  ;;  %v1517_v41 = vsub.f32 %v84_v56, %v1501_v44  ;;  %v1520_v34 = vsub.f32 %v68_v58, %v1503_v49  ;;  %1006 = vmatpush3.msra.mxu0 %v1499_v48 }
  0x34   :  { %1930 = vst [vmem:[#allocation16_spill] sm:$0xff] %v1506_v52  ;;  %1035 = vmatpush3.msra.mxu1 %v246_v0  ;;  %v1522_v36 = vand.u32 4294901760, %v82_v46  ;;  %v1875_v50 = vand.u32 4294901760, %v1506_v52  ;;  %v1527_v63 = vsub.f32 %v83_v38, %v1508_v53  ;;  %v1532_v55 = vand.u32 4294901760, %v66_v39  ;;  %1007 = vmatprep.subr.mxu0 %v1501_v44 }
  0x35   :  { %1931 = vst [vmem:[#allocation17_spill] sm:$0xff] %v1514_v59  ;;  %1932 = vst [vmem:[#allocation18_spill] sm:$0xff] %v1517_v41  ;;  %1036 = vmatprep.subr.mxu1 %v365_v43  ;;  %v1530_v0 = vsub.f32 %v67_v42, %v1510_v54  ;;  %v1878_v56 = vand.u32 4294901760, %v1514_v59  ;;  %v1879_v58 = vand.u32 4294901760, %v1517_v41  ;;  %v1885_v33 = vand.u32 4294901760, %v1520_v34  ;;  %1008 = vmatpush3.msra.mxu0 %v1503_v49 }
  0x36   :  { %1933 = vst [vmem:[#allocation19_spill] sm:$0xff] %v1520_v34  ;;  %1934 = vst [vmem:[#allocation20_spill] sm:$0xff] %v1522_v36  ;;  %1037 = vmatpush3.msra.mxu1 %v253_v37  ;;  %v1539_v43 = vsub.f32 %v82_v46, %v1522_v36  ;;  %v378_v38 = vsub.f32 %v1506_v52, %v1875_v50  ;;  %v1892_v42 = vand.u32 4294901760, %v1527_v63  ;;  %1009 = vmatprep.subr.mxu0 %v1508_v53 }
  0x37   :  { %1935 = vst [vmem:[#allocation21_spill] sm:$0xff] %v1527_v63  ;;  %1936 = vst [vmem:[#allocation22_spill] sm:$0xff] %v1530_v0  ;;  %1038 = vmatprep.subr.mxu1 %v372_v47  ;;  %v1893_v37 = vand.u32 4294901760, %v1530_v0  ;;  %v1548_v30 = vsub.f32 %v66_v39, %v1532_v55  ;;  %v266_v46 = vsub.f32 %v1514_v59, %v1878_v56  ;;  %1010 = vmatpush3.msra.mxu0 %v1510_v54  ;;  %v64_v59 = vld [vmem:[#allocation5 + $0x10] sm:$0xff] }
  0x38   :  { %1937 = vst [vmem:[#allocation23_spill] sm:$0xff] %v1539_v43  ;;  %1039 = vmatpush3.msra.mxu1 %v260_v51  ;;  %v385_v47 = vsub.f32 %v1517_v41, %v1879_v58  ;;  %v273_v50 = vsub.f32 %v1520_v34, %v1885_v33  ;;  %v379_v39 = vand.u32 4294901760, %v378_v38  ;;  %v392_v51 = vsub.f32 %v1527_v63, %v1892_v42  ;;  %v80_v41 = vld [vmem:[#allocation5 + $0x90] sm:$0xff]  ;;  %v63_v42 = vld [vmem:[#allocation5 + $0x8] sm:$0xff] }
  0x39   :  { %1938 = vst [vmem:[#allocation24_spill] sm:$0xff] %v1548_v30  ;;  %v280_v56 = vsub.f32 %v1530_v0, %v1893_v37  ;;  %v1904_v58 = vand.u32 4294901760, %v1548_v30  ;;  %1011 = vmatprep.subr.mxu0 %v1522_v36  ;;  %v267_v33 = vand.u32 4294901760, %v266_v46  ;;  %v1939_v38 = vand.u32 4294901760, %v1539_v43  ;;  %v78_v46 = vld [vmem:[#allocation5 + $0x80] sm:$0xff] }
  0x3a   :  { %v386_v29 = vand.u32 4294901760, %v385_v47  ;;  %v274_v34 = vand.u32 4294901760, %v273_v50  ;;  %1012 = vmatpush3.msra.mxu0 %v1532_v55  ;;  %1040 = vmatprep.subr.mxu1 %v379_v39  ;;  %v393_v37 = vand.u32 4294901760, %v392_v51  ;;  %v1577_v40 = vand.u32 4294901760, %v81_v28 }
  0x3b   :  { %v399_v52 = vsub.f32 %v1539_v43, %v1939_v38  ;;  %v281_v0 = vand.u32 4294901760, %v280_v56  ;;  %v287_v63 = vsub.f32 %v1548_v30, %v1904_v58  ;;  %1041 = vmatpush3.msra.mxu1 %v267_v33  ;;  %v1579_v47 = vand.u32 4294901760, %v65_v24  ;;  %v62_v43 = vld [vmem:[#allocation5] sm:$0xff] }
  0x3c   :  { %v1581_v36 = vand.u32 4294901760, %v80_v41  ;;  %v1583_v38 = vand.u32 4294901760, %v64_v59  ;;  %1042 = vmatprep.subr.mxu1 %v386_v29  ;;  %v1586_v56 = vsub.f32 %v81_v28, %v1577_v40  ;;  %v1588_v51 = vand.u32 4294901760, %v79_v45  ;;  %1013 = vmatprep.subr.mxu0 %v1577_v40 }
  0x3d   :  { %v400_v50 = vand.u32 4294901760, %v399_v52  ;;  %1940 = vst [vmem:[#allocation25_spill] sm:$0xff] %v1579_v47  ;;  %v288_v39 = vand.u32 4294901760, %v287_v63  ;;  %v1590_v58 = vand.u32 4294901760, %v63_v42  ;;  %1043 = vmatpush3.msra.mxu1 %v274_v34  ;;  %v1594_v33 = vsub.f32 %v65_v24, %v1579_v47  ;;  %1014 = vmatpush3.msra.mxu0 %v1579_v47 }
  0x3e   :  { %1941 = vst [vmem:[#allocation26_spill] sm:$0xff] %v1586_v56  ;;  %1942 = vst [vmem:[#allocation27_spill] sm:$0xff] %v1588_v51  ;;  %v1597_v52 = vsub.f32 %v80_v41, %v1581_v36  ;;  %v1600_v30 = vsub.f32 %v64_v59, %v1583_v38  ;;  %v1602_v29 = vand.u32 4294901760, %v78_v46  ;;  %1044 = vmatprep.subr.mxu1 %v393_v37  ;;  %v1909_v28 = vand.u32 4294901760, %v1586_v56 }
  0x3f   :  { %1943 = vst [vmem:[#allocation28_spill] sm:$0xff] %v1594_v33  ;;  %v1607_v63 = vsub.f32 %v79_v45, %v1588_v51  ;;  %v1610_v34 = vsub.f32 %v63_v42, %v1590_v58  ;;  %v1612_v24 = vand.u32 4294901760, %v62_v43  ;;  %1015 = vmatprep.subr.mxu0 %v1581_v36  ;;  %1045 = vmatpush3.msra.mxu1 %v281_v0 }
  0x40   :  { %1944 = vst [vmem:[#allocation29_spill] sm:$0xff] %v1597_v52  ;;  %1945 = vst [vmem:[#allocation30_spill] sm:$0xff] %v1600_v30  ;;  %v1916_v41 = vand.u32 4294901760, %v1597_v52  ;;  %v1619_v37 = vsub.f32 %v78_v46, %v1602_v29  ;;  %1016 = vmatpush3.msra.mxu0 %v1583_v38  ;;  %1046 = vmatprep.subr.mxu1 %v400_v50  ;;  %v406_v45 = vsub.f32 %v1586_v56, %v1909_v28 }
  0x41   :  { %v1628_v59 = vsub.f32 %v62_v43, %v1612_v24  ;;  %1017 = vmatprep.subr.mxu0 %v1588_v51  ;;  %1047 = vmatpush3.msra.mxu1 %v288_v39  ;;  %v1946_v46 = vand.u32 4294901760, %v1594_v33  ;;  %v1947_v28 = vand.u32 4294901760, %v1600_v30  ;;  %v1948_v56 = vand.u32 4294901760, %v1607_v63 }
  0x42   :  { %v413_v50 = vsub.f32 %v1597_v52, %v1916_v41  ;;  %v1922_v0 = vand.u32 4294901760, %v1619_v37  ;;  %1018 = vmatpush3.msra.mxu0 %v1590_v58  ;;  %v407_v43 = vand.u32 4294901760, %v406_v45  ;;  %v1949_v51 = vand.u32 4294901760, %v1610_v34 }
  0x43   :  { %v294_v47 = vsub.f32 %v1594_v33, %v1946_v46  ;;  %v301_v42 = vsub.f32 %v1600_v30, %v1947_v28  ;;  %v420_v39 = vsub.f32 %v1607_v63, %v1948_v56  ;;  %v1921_v33 = vand.u32 4294901760, %v1628_v59  ;;  %1019 = vmatprep.subr.mxu0 %v1602_v29 }
  0x44   :  { %v308_v46 = vsub.f32 %v1610_v34, %v1949_v51  ;;  %v414_v52 = vand.u32 4294901760, %v413_v50  ;;  %v427_v30 = vsub.f32 %v1619_v37, %v1922_v0  ;;  %1020 = vmatpush3.msra.mxu0 %v1612_v24  ;;  %1048 = vmatprep.subr.mxu1 %v407_v43 }
  0x45   :  { %v295_v41 = vand.u32 4294901760, %v294_v47  ;;  %v302_v28 = vand.u32 4294901760, %v301_v42  ;;  %v421_v45 = vand.u32 4294901760, %v420_v39  ;;  %v315_v56 = vsub.f32 %v1628_v59, %v1921_v33  ;;  %1059 = vmatprep.subr.mxu0 %v1346_v16 }
  0x46   :  { %v309_v51 = vand.u32 4294901760, %v308_v46  ;;  %v428_v47 = vand.u32 4294901760, %v427_v30 }
  0x47   :  { %1049 = vmatpush3.msra.mxu1 %v295_v41  ;;  %v316_v42 = vand.u32 4294901760, %v315_v56 }
  0x48   :  { %1050 = vmatprep.subr.mxu1 %v414_v52 }
  0x49   :  { %1051 = vmatpush3.msra.mxu1 %v302_v28 }
  0x4a   :  { %1052 = vmatprep.subr.mxu1 %v421_v45 }
  0x4b   :  { %1053 = vmatpush3.msra.mxu1 %v309_v51 }
  0x4c   :  { %1054 = vmatprep.subr.mxu1 %v428_v47 }
  0x4d   :  { %1055 = vmatpush3.msra.mxu1 %v316_v42  ;;  %v1953_v42 = vld [vmem:[#allocation14_spill] sm:$0xff] }
  0x4e   :  { %1094 = vmatprep.subr.mxu1 %v1335_v5 }
  0xa9   :  { %v47_v50 = vpop.xlane.xlu0 %46 }
  0xaa   :  { %v48_v43 = vsub.f32 %v1331_v3, %v47_v50  ;;  %v49_v39 = vsub.f32 %v1333_v4, %v47_v50  ;;  %v1954_v50 = vld [vmem:[#allocation20_spill] sm:$0xff] }
  0xac   :  { %v50_v33 = vmul.f32 1.442695, %v48_v43  ;;  %v52_v0 = vmul.f32 1.442695, %v49_v39  ;;  %v1955_v43 = vld [vmem:[#allocation15_spill] sm:$0xff]  ;;  %v1956_v39 = vld [vmem:[#allocation16_spill] sm:$0xff] }
  0xae   :  { %1205 = vpow2.f32 %v50_v33 }
  0xaf   :  { %1207 = vpow2.f32 %v52_v0 }
  0xbb   :  { %v1661_v41 = vpop.eup %1205 }
  0xbc   :  { %1950 = vst [vmem:[#allocation31_spill] sm:$0xff] %v1661_v41  ;;  %v1663_v30 = vpop.eup %1207  ;;  %v1666_v52 = vand.u32 4294901760, %v1661_v41 }
  0xbd   :  { %1951 = vst [vmem:[#allocation32_spill] sm:$0xff] %v1663_v30  ;;  %v1669_v46 = vand.u32 4294901760, %v1663_v30  ;;  %v54_v28 = vadd.f32 %v1663_v30, %v1661_v41 }
  0xbe   :  { %1952 = vst [vmem:[#allocation33_spill] sm:$0xff] %v1666_v52  ;;  %v1675_v3 = vsub.f32 %v1661_v41, %v1666_v52  ;;  %v1966_v41 = vld [vmem:[#allocation26_spill] sm:$0xff] }
  0xbf   :  { %431 = vmatprep.mubr.f32.mxu1 %v1669_v46  ;;  %55 = vadd.xlane.f32.xlu0 %v54_v28  ;;  %v191_v4 = vsub.f32 %v1663_v30, %v1669_v46  ;;  %v1957_v28 = vld [vmem:[#allocation17_spill] sm:$0xff]  ;;  %v1965_v30 = vld [vmem:[#allocation24_spill] sm:$0xff] }
  0xc0   :  { %433 = vmatmul.mubr.f32.vlgmr.msra.gmra.mxu1 %v1666_v52  ;;  %v1923_v33 = vand.u32 4294901760, %v1675_v3  ;;  %v1967_v52 = vand.u32 4294901760, %v1675_v3 }
  0xc1   :  { %1095 = vmatpush3.msra.mxu1 %v1337_v9  ;;  %v192_v0 = vand.u32 4294901760, %v191_v4 }
  0xc2   :  { %1096 = vmatprep.subr.mxu1 %v1339_v10  ;;  %v199_v45 = vsub.f32 %v1675_v3, %v1923_v33  ;;  %v1964_v33 = vld [vmem:[#allocation23_spill] sm:$0xff] }
  0xc3   :  { %1097 = vmatpush3.msra.mxu1 %v1341_v11  ;;  %675 = vmatprep.mubr.f32.mxu1 %v192_v0  ;;  %v193_v56 = vsub.f32 %v191_v4, %v192_v0  ;;  %v1959_v0 = vld [vmem:[#allocation18_spill] sm:$0xff] }
  0xc4   :  { %1098 = vmatprep.subr.mxu1 %v1348_v17  ;;  %v200_v51 = vand.u32 4294901760, %v199_v45  ;;  %v1960_v45 = vld [vmem:[#allocation19_spill] sm:$0xff] }
  0xc5   :  { %1099 = vmatpush3.msra.mxu1 %v1350_v18  ;;  %v194_v47 = vand.u32 4294901760, %v193_v56  ;;  %v1961_v56 = vld [vmem:[#allocation21_spill] sm:$0xff] }
  0xc6   :  { %1100 = vmatprep.subr.mxu1 %v1362_v23 }
  0xc7   :  { %1101 = vmatpush3.msra.mxu1 %v1372_v27  ;;  %195 = vmatprep.mubr.f32.mxu0 %v194_v47  ;;  %v1963_v47 = vld [vmem:[#allocation22_spill] sm:$0xff] }
  0xc8   :  { %1102 = vmatprep.subr.mxu1 %v1417_v57  ;;  %201 = vmatmul.mubr.f32.vlgmr.msra.gmra.mxu0 %v200_v51  ;;  %v1962_v51 = vld [vmem:[#allocation27_spill] sm:$0xff] }
  0xc9   :  { %1060 = vmatpush3.msra.mxu0 %v1354_v20  ;;  %1103 = vmatpush3.msra.mxu1 %v1419_v60 }
  0xca   :  { %1061 = vmatprep.subr.mxu0 %v1357_v21  ;;  %568 = vmatprep.mubr.f32.mxu0 %v191_v4  ;;  %v1958_v4 = vld [vmem:[#allocation25_spill] sm:$0xff] }
  0xcb   :  { %1104 = vmatprep.subr.mxu1 %v1421_v61  ;;  %1062 = vmatpush3.msra.mxu0 %v1360_v22 }
  0xcc   :  { %1105 = vmatpush3.msra.mxu1 %v1423_v62  ;;  %1063 = vmatprep.subr.mxu0 %v1367_v25 }
  0xcd   :  { %1106 = vmatprep.subr.mxu1 %v1428_v2  ;;  %1064 = vmatpush3.msra.mxu0 %v1370_v26 }
  0xce   :  { %1107 = vmatpush3.msra.mxu1 %v1430_v6  ;;  %1065 = vmatprep.subr.mxu0 %v1379_v31 }
  0xcf   :  { %1108 = vmatprep.subr.mxu1 %v1442_v13  ;;  %1066 = vmatpush3.msra.mxu0 %v1388_v35 }
  0xd0   :  { %1109 = vmatpush3.msra.mxu1 %v1452_v32  ;;  %1067 = vmatprep.subr.mxu0 %v1426_v1 }
  0xd1   :  { %1110 = vmatprep.subr.mxu1 %v1497_v14  ;;  %1068 = vmatpush3.msra.mxu0 %v1434_v7 }
  0xd2   :  { %1111 = vmatpush3.msra.mxu1 %v1499_v48  ;;  %1069 = vmatprep.subr.mxu0 %v1437_v8 }
  0xd3   :  { %1112 = vmatprep.subr.mxu1 %v1501_v44  ;;  %1070 = vmatpush3.msra.mxu0 %v1440_v12 }
  0xd4   :  { %1113 = vmatpush3.msra.mxu1 %v1503_v49  ;;  %1071 = vmatprep.subr.mxu0 %v1447_v15 }
  0xd5   :  { %1114 = vmatprep.subr.mxu1 %v1508_v53  ;;  %1072 = vmatpush3.msra.mxu0 %v1450_v19 }
  0xd6   :  { %1115 = vmatpush3.msra.mxu1 %v1510_v54  ;;  %1073 = vmatprep.subr.mxu0 %v1953_v42 }
  0xd7   :  { %1116 = vmatprep.subr.mxu1 %v1954_v50  ;;  %1074 = vmatpush3.msra.mxu0 %v1955_v43 }
  0xd8   :  { %1117 = vmatpush3.msra.mxu1 %v1532_v55  ;;  %1075 = vmatprep.subr.mxu0 %v1956_v39 }
  0xd9   :  { %1118 = vmatprep.subr.mxu1 %v1577_v40  ;;  %1076 = vmatpush3.msra.mxu0 %v1957_v28 }
  0xda   :  { %1119 = vmatpush3.msra.mxu1 %v1958_v4  ;;  %1077 = vmatprep.subr.mxu0 %v1959_v0 }
  0xdb   :  { %1120 = vmatprep.subr.mxu1 %v1581_v36  ;;  %1078 = vmatpush3.msra.mxu0 %v1960_v45 }
  0xdc   :  { %1121 = vmatpush3.msra.mxu1 %v1583_v38  ;;  %1079 = vmatprep.subr.mxu0 %v1961_v56 }
  0xdd   :  { %1122 = vmatprep.subr.mxu1 %v1962_v51  ;;  %1080 = vmatpush3.msra.mxu0 %v1963_v47  ;;  %v1968_v51 = vld [vmem:[#allocation28_spill] sm:$0xff] }
  0xde   :  { %1123 = vmatpush3.msra.mxu1 %v1590_v58  ;;  %1081 = vmatprep.subr.mxu0 %v1964_v33  ;;  %v1969_v33 = vld [vmem:[#allocation29_spill] sm:$0xff] }
  0xdf   :  { %1124 = vmatprep.subr.mxu1 %v1602_v29  ;;  %1082 = vmatpush3.msra.mxu0 %v1965_v30  ;;  %v1970_v30 = vld [vmem:[#allocation30_spill] sm:$0xff] }
  0xe0   :  { %1125 = vmatpush3.msra.mxu1 %v1612_v24  ;;  %1083 = vmatprep.subr.mxu0 %v1966_v41 }
  0xe1   :  { %679 = vmatmul.mubr.f32.vlgmr.msra.gmra.mxu1 %v1967_v52  ;;  %1164 = vmatprep.subr.mxu1 %v1335_v5  ;;  %v1971_v5 = vand.u32 4294901760, %v1346_v16  ;;  %v1975_v16 = vand.u32 4294901760, %v1367_v25  ;;  %v1982_v25 = vand.u32 4294901760, %v1440_v12 }
  0xe2   :  { %1084 = vmatpush3.msra.mxu0 %v1968_v51  ;;  %1165 = vmatpush3.msra.mxu1 %v1337_v9  ;;  %v1972_v9 = vand.u32 4294901760, %v1354_v20  ;;  %v1978_v20 = vand.u32 4294901760, %v1388_v35  ;;  %v1986_v35 = vand.u32 4294901760, %v1955_v43 }
  0xe3   :  { %949 = vmatprep.mubr.f32.mxu1 %v1669_v46  ;;  %1085 = vmatprep.subr.mxu0 %v1969_v33 }
  0xe4   :  { %1166 = vmatprep.subr.mxu1 %v1339_v10  ;;  %1086 = vmatpush3.msra.mxu0 %v1970_v30  ;;  %v1973_v10 = vand.u32 4294901760, %v1357_v21  ;;  %v1979_v21 = vand.u32 4294901760, %v1426_v1  ;;  %v1992_v1 = vld [vmem:[#allocation27_spill] sm:$0xff] }
  0xe5   :  { %1167 = vmatpush3.msra.mxu1 %v1341_v11  ;;  %1087 = vmatprep.subr.mxu0 %v1607_v63  ;;  %v1974_v11 = vand.u32 4294901760, %v1360_v22  ;;  %v1980_v22 = vand.u32 4294901760, %v1434_v7 }
  0xe6   :  { %1168 = vmatprep.subr.mxu1 %v1348_v17  ;;  %1088 = vmatpush3.msra.mxu0 %v1610_v34  ;;  %v1976_v17 = vand.u32 4294901760, %v1370_v26  ;;  %v1983_v26 = vand.u32 4294901760, %v1447_v15  ;;  %v2000_v15 = vand.u32 4294901760, %v1968_v51 }
  0xe7   :  { %1169 = vmatpush3.msra.mxu1 %v1350_v18  ;;  %1089 = vmatprep.subr.mxu0 %v1619_v37  ;;  %v1977_v18 = vand.u32 4294901760, %v1379_v31  ;;  %v1985_v31 = vand.u32 4294901760, %v1953_v42 }
  0xe8   :  { %1170 = vmatprep.subr.mxu1 %v1362_v23  ;;  %1090 = vmatpush3.msra.mxu0 %v1628_v59  ;;  %v1981_v23 = vand.u32 4294901760, %v1437_v8  ;;  %v1996_v8 = vld [vmem:[#allocation24_spill] sm:$0xff] }
  0xe9   :  { %1171 = vmatpush3.msra.mxu1 %v1372_v27  ;;  %571 = vmatmul.mubr.f32.vlgmr.msra.gmra.mxu0 %v1675_v3  ;;  %v1984_v27 = vand.u32 4294901760, %v1450_v19  ;;  %v1997_v12 = vand.u32 4294901760, %v1996_v8  ;;  %v2001_v19 = vand.u32 4294901760, %v1969_v33 }
  0xea   :  { %1129 = vmatprep.subr.mxu0 %v1971_v5  ;;  %1172 = vmatprep.subr.mxu1 %v1417_v57  ;;  %v1988_v57 = vand.u32 4294901760, %v1957_v28 }
  0xeb   :  { %1130 = vmatpush3.msra.mxu0 %v1972_v9  ;;  %845 = vmatprep.mubr.f32.mxu0 %v1669_v46 }
  0xec   :  { %1173 = vmatpush3.msra.mxu1 %v1419_v60  ;;  %1131 = vmatprep.subr.mxu0 %v1973_v10  ;;  %v1989_v60 = vand.u32 4294901760, %v1959_v0 }
  0xed   :  { %1174 = vmatprep.subr.mxu1 %v1421_v61  ;;  %1132 = vmatpush3.msra.mxu0 %v1974_v11  ;;  %v1990_v61 = vand.u32 4294901760, %v1960_v45 }
  0xee   :  { %1175 = vmatpush3.msra.mxu1 %v1423_v62  ;;  %1133 = vmatprep.subr.mxu0 %v1975_v16  ;;  %v1991_v62 = vand.u32 4294901760, %v1961_v56 }
  0xef   :  { %1176 = vmatprep.subr.mxu1 %v1428_v2  ;;  %1134 = vmatpush3.msra.mxu0 %v1976_v17  ;;  %v1993_v2 = vand.u32 4294901760, %v1963_v47 }
  0xf0   :  { %1177 = vmatpush3.msra.mxu1 %v1430_v6  ;;  %1135 = vmatprep.subr.mxu0 %v1977_v18  ;;  %v1994_v6 = vld [vmem:[#allocation23_spill] sm:$0xff] }
  0xf1   :  { %1178 = vmatprep.subr.mxu1 %v1442_v13  ;;  %1136 = vmatpush3.msra.mxu0 %v1978_v20  ;;  %v1995_v7 = vand.u32 4294901760, %v1994_v6  ;;  %v1998_v13 = vand.u32 4294901760, %v1966_v41 }
  0xf2   :  { %1179 = vmatpush3.msra.mxu1 %v1452_v32  ;;  %1137 = vmatprep.subr.mxu0 %v1979_v21  ;;  %v2002_v32 = vand.u32 4294901760, %v1970_v30 }
  0xf3   :  { %1180 = vmatprep.subr.mxu1 %v1497_v14  ;;  %1138 = vmatpush3.msra.mxu0 %v1980_v22  ;;  %v1999_v14 = vld [vmem:[#allocation33_spill] sm:$0xff] }
  0xf4   :  { %1181 = vmatpush3.msra.mxu1 %v1499_v48  ;;  %1139 = vmatprep.subr.mxu0 %v1981_v23  ;;  %v2006_v48 = vand.u32 4294901760, %v1628_v59 }
  0xf5   :  { %1182 = vmatprep.subr.mxu1 %v1501_v44  ;;  %1140 = vmatpush3.msra.mxu0 %v1982_v25  ;;  %v1987_v44 = vand.u32 4294901760, %v1956_v39 }
  0xf6   :  { %1183 = vmatpush3.msra.mxu1 %v1503_v49  ;;  %1141 = vmatprep.subr.mxu0 %v1983_v26  ;;  %v2004_v49 = vand.u32 4294901760, %v1610_v34 }
  0xf7   :  { %1184 = vmatprep.subr.mxu1 %v1508_v53  ;;  %1142 = vmatpush3.msra.mxu0 %v1984_v27 }
  0xf8   :  { %1185 = vmatpush3.msra.mxu1 %v1510_v54  ;;  %1143 = vmatprep.subr.mxu0 %v1985_v31  ;;  %v2005_v54 = vand.u32 4294901760, %v1619_v37 }
  0xf9   :  { %1186 = vmatprep.subr.mxu1 %v1954_v50  ;;  %1144 = vmatpush3.msra.mxu0 %v1986_v35 }
  0xfa   :  { %1187 = vmatpush3.msra.mxu1 %v1532_v55  ;;  %1145 = vmatprep.subr.mxu0 %v1987_v44  ;;  %v2007_v55 = vld [vmem:[#allocation31_spill] sm:$0xff] }
  0xfb   :  { %1188 = vmatprep.subr.mxu1 %v1577_v40  ;;  %1146 = vmatpush3.msra.mxu0 %v1988_v57  ;;  %v2003_v40 = vand.u32 4294901760, %v1607_v63 }
  0xfc   :  { %1189 = vmatpush3.msra.mxu1 %v1958_v4  ;;  %1147 = vmatprep.subr.mxu0 %v1989_v60 }
  0xfd   :  { %1190 = vmatprep.subr.mxu1 %v1581_v36  ;;  %1148 = vmatpush3.msra.mxu0 %v1990_v61 }
  0xfe   :  { %1191 = vmatpush3.msra.mxu1 %v1583_v38  ;;  %1149 = vmatprep.subr.mxu0 %v1991_v62  ;;  %v2008_v38 = vld [vmem:[#allocation32_spill] sm:$0xff] }
  0xff   :  { %1192 = vmatprep.subr.mxu1 %v1992_v1  ;;  %1150 = vmatpush3.msra.mxu0 %v1993_v2 }
 0x100   :  { %1193 = vmatpush3.msra.mxu1 %v1590_v58  ;;  %1151 = vmatprep.subr.mxu0 %v1995_v7 }
 0x101   :  { %1194 = vmatprep.subr.mxu1 %v1602_v29  ;;  %1152 = vmatpush3.msra.mxu0 %v1997_v12 }
 0x102   :  { %1195 = vmatpush3.msra.mxu1 %v1612_v24  ;;  %1153 = vmatprep.subr.mxu0 %v1998_v13 }
 0x103   :  { %951 = vmatmul.mubr.f32.vlgmr.msra.gmra.mxu1 %v1999_v14  ;;  %1154 = vmatpush3.msra.mxu0 %v2000_v15 }
 0x104   :  { %1155 = vmatprep.subr.mxu0 %v2001_v19 }
 0x105   :  { %1156 = vmatpush3.msra.mxu0 %v2002_v32 }
 0x106   :  { %1157 = vmatprep.subr.mxu0 %v2003_v40 }
 0x107   :  { %1158 = vmatpush3.msra.mxu0 %v2004_v49 }
 0x108   :  { %1159 = vmatprep.subr.mxu0 %v2005_v54 }
 0x109   :  { %1160 = vmatpush3.msra.mxu0 %v2006_v48 }
 0x10a   :  { %847 = vmatmul.mubr.f32.vlgmr.msra.gmra.mxu0 %v1999_v14 }
 0x148   :  { %v56_v53 = vpop.xlane.xlu0 %55 }
 0x149   :  { %1209 = vrcp.f32 %v56_v53 }
 0x156   :  { %v1210_v36 = vpop.eup %1209 }
 0x157   :  { %v58_v58 = vmul.f32 %v1210_v36, %v2007_v55  ;;  %v59_v29 = vmul.f32 %v1210_v36, %v2008_v38 }
 0x159   :  { %60 = vst [vmem:[#allocation7] sm:$0xff] %v58_v58  ;;  %61 = vst [vmem:[#allocation7 + $0x8] sm:$0xff] %v59_v29 }
 0x15a   :  { %1262 = shalt.err (!%p1259_p0)
}
 0x15b   :  { %968 = dma.vmem_to_hbm [thread:$0]  %s966_s1, 256, %s1860_s2, [#allocation4]   ;;  %vm957_vm0 = vcmask 64512  }
 0x15c   :  { %s1304_s2 = smov [#allocation8]  }
 0x15d   :  { %s975_s27 = sshll.u32 %s1304_s2, 4  ;;  %s976_s27 = int_to_ptr.vmem [resolvable:$true] %s975_s27 }
 0x15e   :  { %s1271_s28 = scalar_lea.vmem %s976_s27, 128  ;;  %p1276_p2 = scmp.lt.s32.totalorder %s976_s27, %s976_s27 }
 0x15f   :  { %p1272_p1 = scmp.ne.s32.totalorder %s976_s27, %s1271_s28  ;;  %p1277_p3 = scmp.lt.s32.totalorder %s1271_s28, %s1271_s28 }
 0x161   :  { %p1278_p4 = por %p1277_p3, %p1276_p2 }
 0x163   :  { %p1279_p5 = pnand %p1278_p4, %p1272_p1 }
 0x180   :  { %v1056_v34 = vpop.f32.mrf.mxu1 }
 0x182   :  { %v1057_v37 = vpop.f32.mrf.mxu1 }
 0x183   :  { %v1058_v46 = vadd.f32 %v1057_v37, %v1056_v34 }
 0x188   :  { %v1021_v63 = vpop.f32.mrf.mxu0 }
 0x18a   :  { %v1022_v24 = vpop.f32.mrf.mxu0 }
 0x18b   :  { %v1023_v52 = vadd.f32 %v1022_v24, %v1021_v63 }
 0x18d   :  { %v435_v42 = vadd.f32 %v1058_v46, %v1023_v52 }
 0x1a1   :  { %v1126_v41 = vpop.f32.mrf.mxu1 }
 0x1a3   :  { %v1127_v33 = vpop.f32.mrf.mxu1 }
 0x1a4   :  { %v1128_v28 = vadd.f32 %v1127_v33, %v1126_v41 }
 0x1a9   :  { %v1091_v59 = vpop.f32.mrf.mxu0 }
 0x1ab   :  { %v1092_v30 = vpop.f32.mrf.mxu0 }
 0x1ac   :  { %v1093_v3 = vadd.f32 %v1092_v30, %v1091_v59 }
 0x1ae   :  { %v573_v43 = vadd.f32 %v1093_v3, %v435_v42 }
 0x1b0   :  { %v681_v45 = vadd.f32 %v1128_v28, %v573_v43 }
 0x1c3   :  { %v1196_v50 = vpop.f32.mrf.mxu1 }
 0x1c5   :  { %v1197_v4 = vpop.f32.mrf.mxu1 }
 0x1c6   :  { %v1198_v51 = vadd.f32 %v1197_v4, %v1196_v50 }
 0x1ca   :  { %v1161_v39 = vpop.f32.mrf.mxu0 }
 0x1cc   :  { %v1162_v0 = vpop.f32.mrf.mxu0 }
 0x1cd   :  { %v1163_v56 = vadd.f32 %v1162_v0, %v1161_v39 }
 0x1cf   :  { %v849_v47 = vadd.f32 %v1163_v56, %v681_v45 }
 0x1d1   :  { %v953_v5 = vadd.f32 %v1198_v51, %v849_v47 }
 0x1d3   :  { %v956_v9 = vmul.f32 %v1210_v36, %v953_v5 }
 0x1d5   :  { %958 = vst.msk [vmem:[#allocation8] sm:$0xff] %vm957_vm0, %v956_v9 }
 0x1d6   :  { %1282 = shalt.err (!%p1279_p5)
}
 0x1d7   :  { %978 = dma.vmem_to_hbm [thread:$0]  %s976_s27, 128, %s1861_s3, [#allocation9]  }
 0x1d8   :  { %1295 = dma.done.wait [#allocation4], 256  }
 0x1d9   :  { %1296 = vsyncadd [#allocation4], 4294967040 }
 0x1da   :  { %1297 = dma.done.wait [#allocation9], 128  }
 0x1db   :  { %1298 = vsyncadd [#allocation9], 4294967168 }
 0x1dc   :  { %985 = vsyncpa [#allocation3], 1 }
 0x1dd   :  { %986 = vsyncpa [#allocation6], 1 }
 0x1de   :  { %987 = vsyncpa [#allocation4], 1 }
 0x1df   :  { %988 = vsyncpa [#allocation9], 1 }

</bundles_post_ra>
